<compile_context>
chip_gen: v5e
topology: v5e:2x2
jax: 0.10.0
libtpu: 0.0.40
codegen_flags: <defaults>
</compile_context>

<pallas_src>
import numpy as np
import jax
import jax.numpy as jnp
from jax.experimental import pallas as pl
from jax.experimental.pallas import tpu as pltpu

LANE = 128
SUBLANE = 8
SB = 8  # sequences per output block (sublane-dense accumulator)


def _round_up(x, m):
    return ((x + m - 1) // m) * m


def bov_kernel(tok_ref, w_ref, tab_ref, out_ref):
    # tok_ref : (SB, TL)    int32  token ids of this (sequence-block, token-tile)
    # w_ref   : (SB, TL)    f32    per-position weights (1/len or 0 for pads)
    # tab_ref : (Vpad,Epad) f32    padded embedding table, VMEM-resident
    # out_ref : (SB, Epad)  f32    accumulator, resident across the token axis
    @pl.when(pl.program_id(1) == 0)
    def _():
        out_ref[...] = jnp.zeros_like(out_ref)

    sb, tl = tok_ref.shape
    vpad = tab_ref.shape[0]

    tok = tok_ref[...]                                   # (SB, TL) int32
    w = w_ref[...]                                       # (SB, TL) f32

    # Weighted one-hot over the vocab (lane dim), reduced over the token axis
    # -> per-sequence vocab histogram scaled by 1/len.
    vocab_ids = jax.lax.broadcasted_iota(jnp.int32, (sb, tl, vpad), 2)
    onehot = (tok[:, :, None] == vocab_ids).astype(jnp.float32)   # (SB, TL, Vpad)
    scaled = onehot * w[:, :, None]                               # pads -> 0
    p = jnp.sum(scaled, axis=1)                                   # (SB, Vpad)

    # Single MXU matmul per token tile: (SB, Vpad) @ (Vpad, Epad).
    out_ref[...] += jnp.dot(p, tab_ref[...], preferred_element_type=jnp.float32)


def bov_forward(seqs, embedding_table, vocab_size):
    """seqs: list of 1-D int arrays (variable length). Returns (B, E) f32."""
    B = len(seqs)
    V1, E = embedding_table.shape
    assert V1 == vocab_size + 1
    pad_idx = vocab_size

    if B == 0:  # guard: empty batch
        return jnp.zeros((0, E), jnp.float32)

    # -------- host-side prep (numpy; no per-sequence XLA dispatches) --------
    lens_np = np.array([int(np.asarray(s).shape[0]) for s in seqs], dtype=np.int32)
    Lmax = max(int(lens_np.max()), 1)

    B_pad = _round_up(B, SB)
    if Lmax <= LANE:
        # Short sequences: one token block covering the whole (padded) axis;
        # avoids padding the token axis all the way to 128.
        Lmax_pad = _round_up(Lmax, SUBLANE)
        TL = Lmax_pad
    else:
        TL = LANE  # 128-wide token tiles (fits all generations)
        Lmax_pad = _round_up(Lmax, TL)

    toks_np = np.full((B_pad, Lmax_pad), pad_idx, dtype=np.int32)
    w_np = np.zeros((B_pad, Lmax_pad), dtype=np.float32)
    for i, s in enumerate(seqs):
        n = int(lens_np[i])
        if n:
            ids = np.asarray(s, dtype=np.int32)
            # Host-side id validation: out-of-range ids would select arbitrary
            # table rows; clamp them (PyTorch would raise an index error).
            toks_np[i, :n] = np.clip(ids, 0, vocab_size)
            w_np[i, :n] = np.float32(1.0 / n)
        # n == 0: weights stay zero -> output row is zeros
        # (PyTorch's mean over an empty tensor would be NaN; documented).

    tokens = jnp.asarray(toks_np)
    weights = jnp.asarray(w_np)

    # Pad the table: vocab -> Vpad (matmul K dim), embed -> Epad (lane-dense
    # output / MXU N dim). Extra vocab rows are zero and never selected.
    # TODO(synk): in a real module, pad once at parameter-init time, not per call.
    Vpad = _round_up(V1, LANE)
    Epad = _round_up(E, LANE)
    table = embedding_table.astype(jnp.float32)
    if (Vpad, Epad) != (V1, E):
        table = jnp.pad(table, ((0, Vpad - V1), (0, Epad - E)))

    # Table-resident path only: keep the resident table (and the (SB,TL,Vpad)
    # one-hot intermediate) small enough for v7x's 64 MiB VMEM.
    assert Vpad * Epad * 4 <= 8 * 1024 * 1024 and Vpad <= 2048, (
        "vocab/embed too large for the table-resident one-hot path; "
        "use an HBM-gather kernel instead")

    grid = (B_pad // SB, Lmax_pad // TL)

    out = pl.pallas_call(
        bov_kernel,
        out_shape=jax.ShapeDtypeStruct((B_pad, Epad), jnp.float32),
        grid=grid,
        in_specs=[
            pl.BlockSpec((SB, TL), lambda i, j: (i, j)),        # tokens
            pl.BlockSpec((SB, TL), lambda i, j: (i, j)),        # weights
            pl.BlockSpec((Vpad, Epad), lambda i, j: (0, 0)),    # table: DMA'd once,
                                                                # stays VMEM-resident
        ],
        out_specs=pl.BlockSpec((SB, Epad), lambda i, j: (i, 0)),
        compiler_params=pltpu.CompilerParams(
            dimension_semantics=("parallel", "arbitrary"),
        ),
    )(tokens, weights, table)

    return out[:B, :E]


if __name__ == "__main__":
    embed_size = 32
    vocab_size = 16

    key = jax.random.PRNGKey(0)
    k_table, k_s0, k_s1 = jax.random.split(key, 3)

    # Deterministic embedding table; padding row (index == vocab_size) zeroed
    # to mirror nn.Embedding(padding_idx=vocab_size). The kernel masks pad
    # positions by weight, so it does not rely on this row being zero.
    table = jax.random.normal(k_table, (vocab_size + 1, embed_size), dtype=jnp.float32)
    table = table.at[vocab_size].set(0.0)

    # Two variable-length sequences (batch = 2), seq lens 5 and 8.
    seq0 = jax.random.randint(k_s0, (5,), 0, vocab_size, dtype=jnp.int32)
    seq1 = jax.random.randint(k_s1, (8,), 0, vocab_size, dtype=jnp.int32)
    seqs = [seq0, seq1]

    out = bov_forward(seqs, table, vocab_size)
    out = jax.block_until_ready(out)

    # Pure-JAX reference: embed real tokens, mean over dim 0, stack.
    ref = jnp.stack([jnp.mean(table[s], axis=0) for s in seqs])
    assert out.shape == (len(seqs), embed_size)
    assert jnp.allclose(out, ref, atol=1e-5, rtol=1e-5), "mismatch vs reference"

    print("KERNEL_OK")
</pallas_src>

<mosaic_0001>
module attributes {stable_mosaic.version = 11 : i64} {
  func.func @bov_kernel(%arg0: i32, %arg1: i32, %arg2: memref<8x8xi32, #tpu.memory_space<vmem>>, %arg3: memref<8x8xf32, #tpu.memory_space<vmem>>, %arg4: memref<128x128xf32, #tpu.memory_space<vmem>>, %arg5: memref<8x128xf32, #tpu.memory_space<vmem>>) attributes {dimension_semantics = [#tpu.dimension_semantics<parallel>, #tpu.dimension_semantics<arbitrary>], iteration_bounds = array<i64: 1, 1>, scalar_prefetch = 0 : i64, scratch_operands = 0 : i64, tpu.core_type = #tpu.core_type<tc>, window_params = [{transform_indices = @transform_0, window_bounds = array<i64: 8, 8>}, {transform_indices = @transform_1, window_bounds = array<i64: 8, 8>}, {pipeline_mode = #tpu.pipeline_mode<synchronous>, transform_indices = @transform_2, window_bounds = array<i64: 128, 128>}, {transform_indices = @transform_3, window_bounds = array<i64: 8, 128>}]} {
    %c0_i32 = arith.constant 0 : i32
    %0 = arith.cmpi eq, %arg1, %c0_i32 : i32
    %1 = arith.extui %0 : i1 to i32
    %c0_i32_0 = arith.constant 0 : i32
    %2 = arith.cmpi ne, %1, %c0_i32_0 : i32
    scf.if %2 {
      %cst_11 = arith.constant 0.000000e+00 : f32
      %20 = vector.broadcast %cst_11 : f32 to vector<8x128xf32>
      %c0_12 = arith.constant 0 : index
      %c0_13 = arith.constant 0 : index
      %21 = vector.load %arg5[%c0_12, %c0_13] : memref<8x128xf32, #tpu.memory_space<vmem>>, vector<8x128xf32>
      tpu.vector_store %arg5[%c0_12, %c0_13], %20 {strides = array<i32>} : memref<8x128xf32, #tpu.memory_space<vmem>>, vector<8x128xf32>,
    } else {
    }
    %c0 = arith.constant 0 : index
    %c0_1 = arith.constant 0 : index
    %3 = vector.load %arg2[%c0, %c0_1] : memref<8x8xi32, #tpu.memory_space<vmem>>, vector<8x8xi32>
    %c0_2 = arith.constant 0 : index
    %c0_3 = arith.constant 0 : index
    %4 = vector.load %arg3[%c0_2, %c0_3] : memref<8x8xf32, #tpu.memory_space<vmem>>, vector<8x8xf32>
    %5 = tpu.iota {dimensions = array<i32: 2>} : vector<8x8x128xi32>
    %6 = vector.shape_cast %3 : vector<8x8xi32> to vector<8x8x1xi32>
    %7 = vector.broadcast %6 : vector<8x8x1xi32> to vector<8x8x128xi32>
    %8 = arith.cmpi eq, %7, %5 : vector<8x8x128xi32>
    %9 = arith.extui %8 : vector<8x8x128xi1> to vector<8x8x128xi32>
    %10 = arith.sitofp %9 : vector<8x8x128xi32> to vector<8x8x128xf32>
    %11 = vector.shape_cast %4 : vector<8x8xf32> to vector<8x8x1xf32>
    %12 = vector.broadcast %11 : vector<8x8x1xf32> to vector<8x8x128xf32>
    %13 = arith.mulf %10, %12 : vector<8x8x128xf32>
    %cst = arith.constant dense<0.000000e+00> : vector<8x128xf32>
    %14 = vector.multi_reduction <add>, %13, %cst [1] : vector<8x8x128xf32> to vector<8x128xf32>
    %c0_4 = arith.constant 0 : index
    %c0_5 = arith.constant 0 : index
    %15 = vector.load %arg5[%c0_4, %c0_5] : memref<8x128xf32, #tpu.memory_space<vmem>>, vector<8x128xf32>
    %c0_6 = arith.constant 0 : index
    %c0_7 = arith.constant 0 : index
    %16 = vector.load %arg4[%c0_6, %c0_7] : memref<128x128xf32, #tpu.memory_space<vmem>>, vector<128x128xf32>
    %cst_8 = arith.constant dense<0.000000e+00> : vector<8x128xf32>
    %17 = tpu.matmul %14, %16, %cst_8 {dimension_numbers = #tpu.dot_dimension_numbers<[1], [0], [0], [1], [0, 0, 1, 1], [], []>} : vector<8x128xf32>, vector<128x128xf32>, vector<8x128xf32> -> vector<8x128xf32>
    %18 = arith.addf %15, %17 : vector<8x128xf32>
    %c0_9 = arith.constant 0 : index
    %c0_10 = arith.constant 0 : index
    %19 = vector.load %arg5[%c0_9, %c0_10] : memref<8x128xf32, #tpu.memory_space<vmem>>, vector<8x128xf32>
    tpu.vector_store %arg5[%c0_9, %c0_10], %18 {strides = array<i32>} : memref<8x128xf32, #tpu.memory_space<vmem>>, vector<8x128xf32>,
    return
  }
  func.func @transform_0(%arg0: i32, %arg1: i32) -> (i32, i32) {
    %c0_i32 = arith.constant 0 : i32
    return %arg0, %arg1 : i32, i32
  }
  func.func @transform_1(%arg0: i32, %arg1: i32) -> (i32, i32) {
    %c0_i32 = arith.constant 0 : i32
    return %arg0, %arg1 : i32, i32
  }
  func.func @transform_2(%arg0: i32, %arg1: i32) -> (i32, i32) {
    %c0_i32 = arith.constant 0 : i32
    %c0_i32_0 = arith.constant 0 : i32
    %c0_i32_1 = arith.constant 0 : i32
    return %c0_i32, %c0_i32_0 : i32, i32
  }
  func.func @transform_3(%arg0: i32, %arg1: i32) -> (i32, i32) {
    %c0_i32 = arith.constant 0 : i32
    %c0_i32_0 = arith.constant 0 : i32
    return %arg0, %c0_i32 : i32, i32
  }
}

</mosaic_0001>

<bundles_post_ra>
// kernel: tpu_custom_call.1
= control target key start
LH: loop header
LB: loop body
LE: loop exit
PB: predicated region body
PF: predicated region fallthrough
CT: control target
= control target key end

     0   :  { %8 = vsyncpa [#allocation3], 0  ;;  %s516_s0 = inlined_call_operand.hbm [shape: s32[8,8], index: 0, kind: input, shape index: {}]   ;;  %s517_s1 = inlined_call_operand.hbm [shape: f32[8,8], index: 1, kind: input, shape index: {}]   ;;  %s518_s2 = inlined_call_operand.hbm [shape: f32[128,128], index: 2, kind: input, shape index: {}]   ;;  %s519_s3 = inlined_call_operand.hbm [shape: f32[8,128], index: 3, kind: output, shape index: {}]  }
   0x1   :  { %9 = vsyncpa [#allocation6], 0  ;;  %s27_s14 = sshll.u32 %s517_s1, 4  ;;  %s28_s14 = int_to_ptr.hbm [resolvable:$true] %s27_s14 }
   0x2   :  { %10 = vsyncpa [#allocation4], 0  ;;  %s459_s15 = smov [#allocation5]   ;;  %s16_s19 = sshll.u32 %s516_s0, 4  ;;  %s17_s19 = int_to_ptr.hbm [resolvable:$true] %s16_s19 }
   0x3   :  { %s29_s16 = sshll.u32 %s459_s15, 4  ;;  %s460_s20 = smov [#allocation2]   ;;  %s30_s16 = int_to_ptr.vmem [resolvable:$true] %s29_s16 }
   0x4   :  { %32 = dma.hbm_to_vmem [thread:$0]  %s28_s14, 128, %s30_s16, [#allocation6]  }
   0x5   :  { %s18_s21 = sshll.u32 %s460_s20, 4  ;;  %s37_s24 = sshll.u32 %s518_s2, 4  ;;  %s19_s21 = int_to_ptr.vmem [resolvable:$true] %s18_s21  ;;  %s38_s24 = int_to_ptr.hbm [resolvable:$true] %s37_s24 }
   0x6   :  { %21 = dma.hbm_to_vmem [thread:$0]  %s17_s19, 128, %s19_s21, [#allocation3]  }
   0x7   :  { %s461_s1 = smov [#allocation7]   ;;  %s462_s26 = smov 128  }
   0x8   :  { %s39_s25 = sshll.u32 %s461_s1, 4  ;;  %s463_s27 = smov 8   ;;  %s40_s25 = int_to_ptr.vmem [resolvable:$true] %s39_s25 }
   0x9   :  { %45 = dma.hbm_to_vmem [thread:$0]  %s38_s24, 2048, %s40_s25, [#allocation6], %s462_s26, %s462_s26, %s463_s27  }
   0xa   :  { %453 = dma.done.wait [#allocation3], 128  }
   0xb   :  { %454 = vsyncadd [#allocation3], 4294967168 }
   0xc   :  { %455 = dma.done.wait [#allocation6], 2176  }
   0xd   :  { %456 = vsyncadd [#allocation6], 4294965120  ;;  %v65_v0 = vlaneseq  ;;  %v64_v2 = vld [vmem:[#allocation5] sm:$0xff]  ;;  %v63_v3 = vld [vmem:[#allocation2] sm:$0xff]  ;;  %v464_v39 = vmov 0.0   ;;  %vm284_vm8 = vcmask 1041409  }
   0xe   :  { %v147_v4 = vperm.slane %v64_v2, 0  ;;  %v81_v5 = vperm.slane %v63_v3, 2  ;;  %v67_v6 = vperm.slane %v63_v3, 0  ;;  %v154_v7 = vperm.slane %v64_v2, 1  ;;  %v275_v21 = vld [vmem:[#allocation7 + $0x78] sm:$0xff]  ;;  %v274_v22 = vld [vmem:[#allocation7 + $0x70] sm:$0xff] }
   0xf   :  { %v69_v1 = vshrl.u32 %v65_v0, 7  ;;  %v88_v8 = vperm.slane %v63_v3, 3  ;;  %v74_v9 = vperm.slane %v63_v3, 1  ;;  %v102_v10 = vperm.slane %v63_v3, 5  ;;  %299 = vmatpush.msra.mxu0 %v275_v21  ;;  %v273_v23 = vld [vmem:[#allocation7 + $0x68] sm:$0xff]  ;;  %v272_v25 = vld [vmem:[#allocation7 + $0x60] sm:$0xff] }
  0x10   :  { %v161_v11 = vperm.slane %v64_v2, 2  ;;  %v95_v12 = vperm.slane %v63_v3, 4  ;;  %v175_v13 = vperm.slane %v64_v2, 4  ;;  %v109_v14 = vperm.slane %v63_v3, 6  ;;  %v271_v28 = vld [vmem:[#allocation7 + $0x58] sm:$0xff]  ;;  %v270_v29 = vld [vmem:[#allocation7 + $0x50] sm:$0xff] }
  0x11   :  { %356 = vset.pattern.permute.xlu2 %v69_v1  ;;  %355 = vset.pattern.permute.xlu1 %v69_v1  ;;  %v168_v15 = vperm.slane %v64_v2, 3  ;;  %v189_v16 = vperm.slane %v64_v2, 6  ;;  %v182_v17 = vperm.slane %v64_v2, 5  ;;  %v116_v18 = vperm.slane %v63_v3, 7  ;;  %v269_v30 = vld [vmem:[#allocation7 + $0x48] sm:$0xff]  ;;  %v268_v31 = vld [vmem:[#allocation7 + $0x40] sm:$0xff] }
  0x12   :  { %354 = vset.pattern.permute.xlu0 %v69_v1  ;;  %v196_v19 = vperm.slane %v64_v2, 7  ;;  %300 = vmatpush.msra.mxu0 %v274_v22  ;;  %v267_v35 = vld [vmem:[#allocation7 + $0x38] sm:$0xff]  ;;  %v495_v36 = vand.u32 127, %v65_v0  ;;  %v266_v37 = vld [vmem:[#allocation7 + $0x30] sm:$0xff]  ;;  %v265_v38 = vld [vmem:[#allocation7 + $0x28] sm:$0xff]  ;;  %vm286_vm9 = vcmask 1042434  }
  0x13   :  { %v264_v41 = vld [vmem:[#allocation7 + $0x20] sm:$0xff]  ;;  %v263_v45 = vld [vmem:[#allocation7 + $0x18] sm:$0xff]  ;;  %v262_v50 = vld [vmem:[#allocation7 + $0x10] sm:$0xff]  ;;  %vm288_vm10 = vcmask 1043459   ;;  %vm290_vm11 = vcmask 1044484   ;;  %vm292_vm12 = vcmask 1045509  }
  0x14   :  { %301 = vmatpush.msra.mxu0 %v273_v23  ;;  %v261_v52 = vld [vmem:[#allocation7 + $0x8] sm:$0xff]  ;;  %v260_v53 = vld [vmem:[#allocation7] sm:$0xff]  ;;  %vm294_vm13 = vcmask 1046534   ;;  %vm296_vm14 = vcmask 1047559   ;;  %s465_s0 = smov [#allocation8]   ;;  %s328_s30 = sshll.u32 %s519_s3, 4  ;;  %s329_s30 = int_to_ptr.hbm [resolvable:$true] %s328_s30 }
  0x15   :  { %s326_s2 = sshll.u32 %s465_s0, 4  ;;  %s327_s2 = int_to_ptr.vmem [resolvable:$true] %s326_s2 }
  0x16   :  { %302 = vmatpush.msra.mxu0 %v272_v25 }
  0x18   :  { %303 = vmatpush.msra.mxu0 %v271_v28 }
  0x19   :  { %152 = vperm.xlu2 %356, %v147_v4   ;;  %86 = vperm.xlu1 %355, %v81_v5  }
  0x1a   :  { %72 = vperm.xlu0 %354, %v67_v6   ;;  %304 = vmatpush.msra.mxu0 %v270_v29 }
  0x1c   :  { %305 = vmatpush.msra.mxu0 %v269_v30 }
  0x1e   :  { %306 = vmatpush.msra.mxu0 %v268_v31 }
  0x20   :  { %307 = vmatpush.msra.mxu0 %v267_v35 }
  0x21   :  { %159 = vperm.xlu2 %356, %v154_v7   ;;  %93 = vperm.xlu1 %355, %v88_v8  }
  0x22   :  { %79 = vperm.xlu0 %354, %v74_v9   ;;  %308 = vmatpush.msra.mxu0 %v266_v37 }
  0x24   :  { %309 = vmatpush.msra.mxu0 %v265_v38 }
  0x26   :  { %310 = vmatpush.msra.mxu0 %v264_v41 }
  0x28   :  { %311 = vmatpush.msra.mxu0 %v263_v45 }
  0x29   :  { %107 = vperm.xlu2 %356, %v102_v10   ;;  %166 = vperm.xlu1 %355, %v161_v11  }
  0x2a   :  { %100 = vperm.xlu0 %354, %v95_v12   ;;  %312 = vmatpush.msra.mxu0 %v262_v50 }
  0x2c   :  { %313 = vmatpush.msra.mxu0 %v261_v52 }
  0x2e   :  { %314 = vmatpush.msra.mxu0 %v260_v53 }
  0x31   :  { %180 = vperm.xlu2 %356, %v175_v13   ;;  %114 = vperm.xlu1 %355, %v109_v14  }
  0x32   :  { %173 = vperm.xlu0 %354, %v168_v15  }
  0x39   :  { %194 = vperm.xlu2 %356, %v189_v16   ;;  %187 = vperm.xlu1 %355, %v182_v17  }
  0x3a   :  { %121 = vperm.xlu0 %354, %v116_v18  }
  0x42   :  { %201 = vperm.xlu0 %354, %v196_v19  }
  0x73   :  { %v153_v20 = vpop.permute.xlu2 %152 }
  0x7b   :  { %v160_v24 = vpop.permute.xlu2 %159 }
  0x83   :  { %v108_v32 = vpop.permute.xlu2 %107 }
  0x84   :  { %vm128_vm6 = vcmp.eq.s32.totalorder %v108_v32, %v495_v36 }
  0x85   :  { %v344_v12 = vsel %vm128_vm6, 1.0, %v464_v39 }
  0x8b   :  { %v87_v26 = vpop.permute.xlu1 %86  ;;  %v181_v46 = vpop.permute.xlu2 %180 }
  0x8c   :  { %v73_v27 = vpop.permute.xlu0 %72  ;;  %vm125_vm2 = vcmp.eq.s32.totalorder %v87_v26, %v495_v36 }
  0x8d   :  { %vm123_vm1 = vcmp.eq.s32.totalorder %v73_v27, %v495_v36  ;;  %v341_v48 = vsel %vm125_vm2, 1.0, %v464_v39 }
  0x8e   :  { %v339_v43 = vsel %vm123_vm1, 1.0, %v464_v39 }
  0x8f   :  { %v203_v51 = vmul.f32 %v339_v43, %v153_v20 }
  0x91   :  { %v211_v57 = vrot.slane %v203_v51, 4 }
  0x93   :  { %v94_v33 = vpop.permute.xlu1 %93  ;;  %v212_v2 = vadd.f32 %v211_v57, %v203_v51  ;;  %v195_v3 = vpop.permute.xlu2 %194 }
  0x94   :  { %v80_v34 = vpop.permute.xlu0 %79  ;;  %vm126_vm4 = vcmp.eq.s32.totalorder %v94_v33, %v495_v36 }
  0x95   :  { %vm124_vm0 = vcmp.eq.s32.totalorder %v80_v34, %v495_v36  ;;  %v342_v60 = vsel %vm126_vm4, 1.0, %v464_v39  ;;  %v213_v10 = vrot.slane %v212_v2, 2 }
  0x96   :  { %v340_v40 = vsel %vm124_vm0, 1.0, %v464_v39 }
  0x97   :  { %v204_v47 = vmul.f32 %v340_v40, %v160_v24  ;;  %v214_v21 = vadd.f32 %v213_v10, %v212_v2 }
  0x99   :  { %v217_v54 = vrot.slane %v204_v47, 4  ;;  %v215_v29 = vrot.slane %v214_v21, 1 }
  0x9b   :  { %v167_v42 = vpop.permute.xlu1 %166  ;;  %v218_v62 = vadd.f32 %v217_v54, %v204_v47  ;;  %v216_v41 = vadd.f32 %v215_v29, %v214_v21 }
  0x9c   :  { %v101_v44 = vpop.permute.xlu0 %100  ;;  %v205_v49 = vmul.f32 %v341_v48, %v167_v42 }
  0x9d   :  { %vm127_vm3 = vcmp.eq.s32.totalorder %v101_v44, %v495_v36  ;;  %v219_v7 = vrot.slane %v218_v62, 2 }
  0x9e   :  { %v343_v55 = vsel %vm127_vm3, 1.0, %v464_v39  ;;  %v223_v56 = vrot.slane %v205_v49, 4 }
  0x9f   :  { %v207_v59 = vmul.f32 %v343_v55, %v181_v46  ;;  %v220_v18 = vadd.f32 %v219_v7, %v218_v62 }
  0xa0   :  { %v224_v1 = vadd.f32 %v223_v56, %v205_v49 }
  0xa1   :  { %v235_v5 = vrot.slane %v207_v59, 4  ;;  %v221_v26 = vrot.slane %v220_v18, 1 }
  0xa2   :  { %v225_v9 = vrot.slane %v224_v1, 2 }
  0xa3   :  { %v115_v58 = vpop.permute.xlu1 %114  ;;  %v236_v14 = vadd.f32 %v235_v5, %v207_v59  ;;  %v222_v37 = vadd.f32 %v221_v26, %v220_v18 }
  0xa4   :  { %vm129_vm5 = vcmp.eq.s32.totalorder %v115_v58, %v495_v36  ;;  %v174_v61 = vpop.permute.xlu0 %173  ;;  %v226_v19 = vadd.f32 %v225_v9, %v224_v1 }
  0xa5   :  { %v345_v63 = vsel %vm129_vm5, 1.0, %v464_v39  ;;  %v206_v0 = vmul.f32 %v342_v60, %v174_v61  ;;  %v237_v23 = vrot.slane %v236_v14, 2  ;;  %v285_v46 = vsel %vm284_vm8, %v222_v37, %v216_v41 }
  0xa6   :  { %v209_v6 = vmul.f32 %v345_v63, %v195_v3  ;;  %v227_v27 = vrot.slane %v226_v19, 1 }
  0xa7   :  { %v229_v4 = vrot.slane %v206_v0, 4  ;;  %v238_v31 = vadd.f32 %v237_v23, %v236_v14 }
  0xa8   :  { %v247_v15 = vrot.slane %v209_v6, 4  ;;  %v228_v40 = vadd.f32 %v227_v27, %v226_v19 }
  0xa9   :  { %v230_v8 = vadd.f32 %v229_v4, %v206_v0 }
  0xaa   :  { %v248_v24 = vadd.f32 %v247_v15, %v209_v6  ;;  %v287_v48 = vsel %vm286_vm9, %v228_v40, %v285_v46 }
  0xab   :  { %v231_v11 = vrot.slane %v230_v8, 2  ;;  %v188_v13 = vpop.permute.xlu1 %187 }
  0xac   :  { %v208_v16 = vmul.f32 %v344_v12, %v188_v13  ;;  %v122_v17 = vpop.permute.xlu0 %121  ;;  %v249_v32 = vrot.slane %v248_v24, 2 }
  0xad   :  { %v232_v22 = vadd.f32 %v231_v11, %v230_v8  ;;  %vm130_vm7 = vcmp.eq.s32.totalorder %v122_v17, %v495_v36  ;;  %v239_v36 = vrot.slane %v238_v31, 1 }
  0xae   :  { %v241_v20 = vrot.slane %v208_v16, 4  ;;  %v346_v34 = vsel %vm130_vm7, 1.0, %v464_v39  ;;  %v250_v45 = vadd.f32 %v249_v32, %v248_v24 }
  0xaf   :  { %v233_v30 = vrot.slane %v232_v22, 1  ;;  %v240_v39 = vadd.f32 %v239_v36, %v238_v31 }
  0xb0   :  { %v242_v25 = vadd.f32 %v241_v20, %v208_v16  ;;  %v251_v52 = vrot.slane %v250_v45, 1 }
  0xb1   :  { %v234_v42 = vadd.f32 %v233_v30, %v232_v22 }
  0xb2   :  { %v243_v28 = vrot.slane %v242_v25, 2  ;;  %v252_v57 = vadd.f32 %v251_v52, %v250_v45 }
  0xb3   :  { %v289_v51 = vsel %vm288_vm10, %v234_v42, %v287_v48 }
  0xb4   :  { %v244_v33 = vadd.f32 %v243_v28, %v242_v25  ;;  %v202_v35 = vpop.permute.xlu0 %201  ;;  %v291_v54 = vsel %vm290_vm11, %v240_v39, %v289_v51 }
  0xb5   :  { %v210_v38 = vmul.f32 %v346_v34, %v202_v35 }
  0xb6   :  { %v245_v43 = vrot.slane %v244_v33, 1 }
  0xb7   :  { %v253_v44 = vrot.slane %v210_v38, 4 }
  0xb8   :  { %v246_v49 = vadd.f32 %v245_v43, %v244_v33 }
  0xb9   :  { %v254_v47 = vadd.f32 %v253_v44, %v210_v38 }
  0xba   :  { %v293_v56 = vsel %vm292_vm12, %v246_v49, %v291_v54 }
  0xbb   :  { %v255_v50 = vrot.slane %v254_v47, 2  ;;  %v295_v59 = vsel %vm294_vm13, %v252_v57, %v293_v56 }
  0xbd   :  { %v256_v53 = vadd.f32 %v255_v50, %v254_v47 }
  0xbf   :  { %v257_v55 = vrot.slane %v256_v53, 1 }
  0xc1   :  { %v258_v58 = vadd.f32 %v257_v55, %v256_v53 }
  0xc3   :  { %v297_v60 = vsel %vm296_vm14, %v258_v58, %v295_v59 }
  0xc4   :  { %315 = vmatmul.f32.vlgmr.msra.gmra.mxu0 %v297_v60 }
 0x141   :  { %v316_v61 = vpop.f32.mrf.mxu0 }
 0x142   :  { %320 = vst [vmem:[#allocation8] sm:$0xff] %v316_v61 }
 0x143   :  { %331 = dma.vmem_to_hbm [thread:$0]  %s327_s2, 128, %s329_s30, [#allocation4]  }
 0x144   :  { %457 = dma.done.wait [#allocation4], 128  }
 0x145   :  { %458 = vsyncadd [#allocation4], 4294967168 }
 0x146   :  { %336 = vsyncpa [#allocation3], 1 }
 0x147   :  { %337 = vsyncpa [#allocation6], 1 }
 0x148   :  { %338 = vsyncpa [#allocation4], 1 }

</bundles_post_ra>
